<compile_context>
chip_gen: v5e
topology: v5e:2x2
jax: 0.10.0
libtpu: 0.0.40
codegen_flags: <defaults>
</compile_context>

<pallas_src>
import functools
import math

import jax
import jax.numpy as jnp
from jax.experimental import pallas as pl
from jax.experimental.pallas import tpu as pltpu

_LANE = 128
_SUBLANE = 8


def _softplus(z):
    # torch.nn.functional.softplus(beta=1.0, threshold=20.0)
    # (the minimum() guards exp overflow in the untaken branch)
    return jnp.where(z > 20.0, z, jnp.log1p(jnp.exp(jnp.minimum(z, 20.0))))


def _make_gauss_policy_kernel(n_hidden, out_dim, apply_softplus):
    """Builds a kernel taking (x, w0, b0, ..., w_{n-1}, b_{n-1}, wout, bout, out)."""

    def kernel(x_ref, *refs):
        out_ref = refs[-1]
        prefs = refs[:-1]

        h = x_ref[...]
        # hidden_i + tanh_i
        for l in range(n_hidden):
            w = prefs[2 * l][...]
            b = prefs[2 * l + 1][...]
            h = jnp.tanh(jnp.dot(h, w, preferred_element_type=jnp.float32) + b)

        # fused out_layer: cols [:out_dim] -> loc, [out_dim:2*out_dim] -> pre-softplus scale
        wout = prefs[2 * n_hidden][...]
        bout = prefs[2 * n_hidden + 1][...]
        z = jnp.dot(h, wout, preferred_element_type=jnp.float32) + bout

        if apply_softplus:
            col = jax.lax.broadcasted_iota(jnp.int32, z.shape, dimension=1)
            z = jnp.where(col >= out_dim, _softplus(z), z)

        out_ref[...] = z

    return kernel


def gauss_policy_forward(state, params, *, out_dim, isotropic=None, block_b=None):
    """GaussPolicy.forward: returns (loc, scale) of the diagonal Normal.

    params: flat tuple (w0, b0, w1, b1, ..., wout, bout) with weights laid out
    as (in_features, out_features) (i.e. torch weight transposed) and biases as
    (1, out_features) rows.
    """
    assert len(params) % 2 == 0 and len(params) >= 4
    n_hidden = len(params) // 2 - 1
    hidden_params = list(params[: 2 * n_hidden])
    wout, bout = params[2 * n_hidden], params[2 * n_hidden + 1]

    B, in_dim = state.shape
    two_out = wout.shape[1]
    if isotropic is None:
        assert two_out == 2 * out_dim
    else:
        assert two_out == out_dim

    # --- lane-dense output: zero-pad the fused out layer to a multiple of 128 lanes.
    padded_out = max(_LANE, ((two_out + _LANE - 1) // _LANE) * _LANE)
    if padded_out != two_out:
        wout = jnp.pad(wout, ((0, 0), (0, padded_out - two_out)))
        bout = jnp.pad(bout, ((0, 0), (0, padded_out - two_out)))

    # --- batch tiling (sublane-aligned tile, pad batch up to a multiple of it).
    if block_b is None:
        block_b = min(max(B, _SUBLANE), 512)
    block_b = ((block_b + _SUBLANE - 1) // _SUBLANE) * _SUBLANE
    n_blocks = pl.cdiv(B, block_b)
    B_pad = n_blocks * block_b
    if B_pad != B:
        state = jnp.pad(state, ((0, B_pad - B), (0, 0)))
    grid = (n_blocks,)

    def resident_spec(arr):
        zeros = (0,) * arr.ndim
        return pl.BlockSpec(arr.shape, lambda i, _z=zeros: _z)

    kernel = _make_gauss_policy_kernel(
        n_hidden, out_dim, apply_softplus=(isotropic is None))

    weight_args = tuple(hidden_params) + (wout, bout)

    out = pl.pallas_call(
        kernel,
        grid=grid,
        in_specs=[pl.BlockSpec((block_b, in_dim), lambda i: (i, 0))]  # state tiled on batch
        + [resident_spec(a) for a in weight_args],                    # weights VMEM-resident
        out_specs=pl.BlockSpec((block_b, padded_out), lambda i: (i, 0)),
        out_shape=jax.ShapeDtypeStruct((B_pad, padded_out), jnp.float32),
        compiler_params=pltpu.CompilerParams(
            dimension_semantics=("parallel",)),
    )(state, *weight_args)

    out = out[:B]
    loc = out[:, :out_dim]
    if isotropic is None:
        scale = out[:, out_dim:2 * out_dim]
    else:
        scale = jnp.full_like(loc, isotropic)
    return loc, scale


def init_linear(key, in_f, out_f):
    """PyTorch nn.Linear default init: U(-1/sqrt(fan_in), 1/sqrt(fan_in))."""
    k = 1.0 / math.sqrt(in_f)
    wkey, bkey = jax.random.split(key)
    w = jax.random.uniform(wkey, (out_f, in_f), jnp.float32, -k, k)
    b = jax.random.uniform(bkey, (out_f,), jnp.float32, -k, k)
    return w, b


if __name__ == "__main__":
    # GaussPolicy(in_dim=16, out_dim=8, n_hidden=2, hidden_dim=32, isotropic=None)
    B, in_dim, hidden_dim, out_dim, n_hidden = 64, 16, 32, 8, 2

    key = jax.random.PRNGKey(0)
    k0, k1, k2, kx = jax.random.split(key, 4)
    w0, b0 = init_linear(k0, in_dim, hidden_dim)            # (32, 16), (32,)
    w1, b1 = init_linear(k1, hidden_dim, hidden_dim)        # (32, 32), (32,)
    wout, bout = init_linear(k2, hidden_dim, 2 * out_dim)   # (16, 32), (16,)

    # Kernel layout: x @ W_t + b with W_t = W.T, biases as (1, dim) rows.
    params = (
        w0.T, b0.reshape(1, -1),
        w1.T, b1.reshape(1, -1),
        wout.T, bout.reshape(1, -1),
    )

    state = jax.random.normal(kx, (B, in_dim), jnp.float32)

    # block_b=32 -> grid=(2,) exercises batch tiling / the "parallel" axis.
    loc, scale = gauss_policy_forward(state, params, out_dim=out_dim, block_b=32)
    jax.block_until_ready((loc, scale))

    # Pure-JAX reference of the PyTorch forward (loc / scale of the Normal).
    h = jnp.tanh(state @ w0.T + b0)
    h = jnp.tanh(h @ w1.T + b1)
    out = h @ wout.T + bout
    ref_loc = out[:, :out_dim]
    z = out[:, out_dim:]
    ref_scale = jnp.where(z > 20.0, z, jnp.log1p(jnp.exp(jnp.minimum(z, 20.0))))

    assert loc.shape == (B, out_dim) and scale.shape == (B, out_dim)
    assert jnp.allclose(loc, ref_loc, atol=1e-5, rtol=1e-5)
    assert jnp.allclose(scale, ref_scale, atol=1e-5, rtol=1e-5)
    assert bool(jnp.all(scale > 0.0))

    # Also exercise the isotropic branch (out_layer -> out_dim, constant scale).
    wiso, biso = init_linear(k2, hidden_dim, out_dim)
    iso_params = (w0.T, b0.reshape(1, -1), w1.T, b1.reshape(1, -1),
                  wiso.T, biso.reshape(1, -1))
    iso_loc, iso_scale = gauss_policy_forward(
        state, iso_params, out_dim=out_dim, isotropic=0.5, block_b=32)
    jax.block_until_ready((iso_loc, iso_scale))
    ref_iso_loc = h @ wiso.T + biso
    assert jnp.allclose(iso_loc, ref_iso_loc, atol=1e-5, rtol=1e-5)
    assert bool(jnp.all(iso_scale == 0.5))

    # TODO(synk): torch.distributions.Normal (sample/log_prob/rsample) is host-side
    # glue over (loc, scale); not part of the kernel hot path.
    print("KERNEL_OK")
</pallas_src>

<mosaic_0001>
module attributes {stable_mosaic.version = 11 : i64} {
  func.func @kernel(%arg0: i32, %arg1: memref<32x16xf32, #tpu.memory_space<vmem>>, %arg2: memref<16x32xf32, #tpu.memory_space<vmem>>, %arg3: memref<1x32xf32, #tpu.memory_space<vmem>>, %arg4: memref<32x32xf32, #tpu.memory_space<vmem>>, %arg5: memref<1x32xf32, #tpu.memory_space<vmem>>, %arg6: memref<32x128xf32, #tpu.memory_space<vmem>>, %arg7: memref<1x128xf32, #tpu.memory_space<vmem>>, %arg8: memref<32x128xf32, #tpu.memory_space<vmem>>) attributes {dimension_semantics = [#tpu.dimension_semantics<parallel>], iteration_bounds = array<i64: 2>, scalar_prefetch = 0 : i64, scratch_operands = 0 : i64, tpu.core_type = #tpu.core_type<tc>, window_params = [{transform_indices = @transform_0, window_bounds = array<i64: 32, 16>}, {pipeline_mode = #tpu.pipeline_mode<synchronous>, transform_indices = @transform_1, window_bounds = array<i64: 16, 32>}, {pipeline_mode = #tpu.pipeline_mode<synchronous>, transform_indices = @transform_2, window_bounds = array<i64: 1, 32>}, {pipeline_mode = #tpu.pipeline_mode<synchronous>, transform_indices = @transform_3, window_bounds = array<i64: 32, 32>}, {pipeline_mode = #tpu.pipeline_mode<synchronous>, transform_indices = @transform_4, window_bounds = array<i64: 1, 32>}, {pipeline_mode = #tpu.pipeline_mode<synchronous>, transform_indices = @transform_5, window_bounds = array<i64: 32, 128>}, {pipeline_mode = #tpu.pipeline_mode<synchronous>, transform_indices = @transform_6, window_bounds = array<i64: 1, 128>}, {transform_indices = @transform_7, window_bounds = array<i64: 32, 128>}]} {
    %c0 = arith.constant 0 : index
    %c0_0 = arith.constant 0 : index
    %0 = vector.load %arg1[%c0, %c0_0] : memref<32x16xf32, #tpu.memory_space<vmem>>, vector<32x16xf32>
    %c0_1 = arith.constant 0 : index
    %c0_2 = arith.constant 0 : index
    %1 = vector.load %arg2[%c0_1, %c0_2] : memref<16x32xf32, #tpu.memory_space<vmem>>, vector<16x32xf32>
    %c0_3 = arith.constant 0 : index
    %c0_4 = arith.constant 0 : index
    %2 = vector.load %arg3[%c0_3, %c0_4] : memref<1x32xf32, #tpu.memory_space<vmem>>, vector<1x32xf32>
    %cst = arith.constant dense<0.000000e+00> : vector<32x32xf32>
    %3 = tpu.matmul %0, %1, %cst {dimension_numbers = #tpu.dot_dimension_numbers<[1], [0], [0], [1], [0, 0, 1, 1], [], []>} : vector<32x16xf32>, vector<16x32xf32>, vector<32x32xf32> -> vector<32x32xf32>
    %4 = vector.broadcast %2 : vector<1x32xf32> to vector<32x32xf32>
    %5 = arith.addf %3, %4 : vector<32x32xf32>
    %6 = math.tanh %5 : vector<32x32xf32>
    %c0_5 = arith.constant 0 : index
    %c0_6 = arith.constant 0 : index
    %7 = vector.load %arg4[%c0_5, %c0_6] : memref<32x32xf32, #tpu.memory_space<vmem>>, vector<32x32xf32>
    %c0_7 = arith.constant 0 : index
    %c0_8 = arith.constant 0 : index
    %8 = vector.load %arg5[%c0_7, %c0_8] : memref<1x32xf32, #tpu.memory_space<vmem>>, vector<1x32xf32>
    %cst_9 = arith.constant dense<0.000000e+00> : vector<32x32xf32>
    %9 = tpu.matmul %6, %7, %cst_9 {dimension_numbers = #tpu.dot_dimension_numbers<[1], [0], [0], [1], [0, 0, 1, 1], [], []>} : vector<32x32xf32>, vector<32x32xf32>, vector<32x32xf32> -> vector<32x32xf32>
    %10 = vector.broadcast %8 : vector<1x32xf32> to vector<32x32xf32>
    %11 = arith.addf %9, %10 : vector<32x32xf32>
    %12 = math.tanh %11 : vector<32x32xf32>
    %c0_10 = arith.constant 0 : index
    %c0_11 = arith.constant 0 : index
    %13 = vector.load %arg6[%c0_10, %c0_11] : memref<32x128xf32, #tpu.memory_space<vmem>>, vector<32x128xf32>
    %c0_12 = arith.constant 0 : index
    %c0_13 = arith.constant 0 : index
    %14 = vector.load %arg7[%c0_12, %c0_13] : memref<1x128xf32, #tpu.memory_space<vmem>>, vector<1x128xf32>
    %cst_14 = arith.constant dense<0.000000e+00> : vector<32x128xf32>
    %15 = tpu.matmul %12, %13, %cst_14 {dimension_numbers = #tpu.dot_dimension_numbers<[1], [0], [0], [1], [0, 0, 1, 1], [], []>} : vector<32x32xf32>, vector<32x128xf32>, vector<32x128xf32> -> vector<32x128xf32>
    %16 = vector.broadcast %14 : vector<1x128xf32> to vector<32x128xf32>
    %17 = arith.addf %15, %16 : vector<32x128xf32>
    %18 = tpu.iota {dimensions = array<i32: 1>} : vector<32x128xi32>
    %c8_i32 = arith.constant 8 : i32
    %19 = vector.broadcast %c8_i32 : i32 to vector<32x128xi32>
    %20 = arith.cmpi sge, %18, %19 : vector<32x128xi32>
    %cst_15 = arith.constant 2.000000e+01 : f32
    %21 = vector.broadcast %cst_15 : f32 to vector<32x128xf32>
    %22 = arith.cmpf ogt, %17, %21 : vector<32x128xf32>
    %cst_16 = arith.constant 2.000000e+01 : f32
    %23 = vector.broadcast %cst_16 : f32 to vector<32x128xf32>
    %24 = arith.minimumf %17, %23 : vector<32x128xf32>
    %25 = math.exp %24 : vector<32x128xf32>
    %26 = math.log1p %25 : vector<32x128xf32>
    %27 = arith.select %22, %17, %26 : vector<32x128xi1>, vector<32x128xf32>
    %28 = arith.select %20, %27, %17 : vector<32x128xi1>, vector<32x128xf32>
    %c0_17 = arith.constant 0 : index
    %c0_18 = arith.constant 0 : index
    %29 = vector.load %arg8[%c0_17, %c0_18] : memref<32x128xf32, #tpu.memory_space<vmem>>, vector<32x128xf32>
    tpu.vector_store %arg8[%c0_17, %c0_18], %28 {strides = array<i32>} : memref<32x128xf32, #tpu.memory_space<vmem>>, vector<32x128xf32>,
    return
  }
  func.func @transform_0(%arg0: i32) -> (i32, i32) {
    %c0_i32 = arith.constant 0 : i32
    %c0_i32_0 = arith.constant 0 : i32
    return %arg0, %c0_i32 : i32, i32
  }
  func.func @transform_1(%arg0: i32) -> (i32, i32) {
    %c0_i32 = arith.constant 0 : i32
    %c0_i32_0 = arith.constant 0 : i32
    %c0_i32_1 = arith.constant 0 : i32
    return %c0_i32, %c0_i32_0 : i32, i32
  }
  func.func @transform_2(%arg0: i32) -> (i32, i32) {
    %c0_i32 = arith.constant 0 : i32
    %c0_i32_0 = arith.constant 0 : i32
    %c0_i32_1 = arith.constant 0 : i32
    return %c0_i32, %c0_i32_0 : i32, i32
  }
  func.func @transform_3(%arg0: i32) -> (i32, i32) {
    %c0_i32 = arith.constant 0 : i32
    %c0_i32_0 = arith.constant 0 : i32
    %c0_i32_1 = arith.constant 0 : i32
    return %c0_i32, %c0_i32_0 : i32, i32
  }
  func.func @transform_4(%arg0: i32) -> (i32, i32) {
    %c0_i32 = arith.constant 0 : i32
    %c0_i32_0 = arith.constant 0 : i32
    %c0_i32_1 = arith.constant 0 : i32
    return %c0_i32, %c0_i32_0 : i32, i32
  }
  func.func @transform_5(%arg0: i32) -> (i32, i32) {
    %c0_i32 = arith.constant 0 : i32
    %c0_i32_0 = arith.constant 0 : i32
    %c0_i32_1 = arith.constant 0 : i32
    return %c0_i32, %c0_i32_0 : i32, i32
  }
  func.func @transform_6(%arg0: i32) -> (i32, i32) {
    %c0_i32 = arith.constant 0 : i32
    %c0_i32_0 = arith.constant 0 : i32
    %c0_i32_1 = arith.constant 0 : i32
    return %c0_i32, %c0_i32_0 : i32, i32
  }
  func.func @transform_7(%arg0: i32) -> (i32, i32) {
    %c0_i32 = arith.constant 0 : i32
    %c0_i32_0 = arith.constant 0 : i32
    return %arg0, %c0_i32 : i32, i32
  }
}

</mosaic_0001>

<bundles_post_ra>
// kernel: tpu_custom_call.1
= control target key start
LH: loop header
LB: loop body
LE: loop exit
PB: predicated region body
PF: predicated region fallthrough
CT: control target
= control target key end

     0   :  { %12 = vsyncpa [#allocation3], 0  ;;  %s952_s0 = inlined_call_operand.vmem [shape: f32[64,16], index: 0, kind: input, shape index: {}]   ;;  %s953_s1 = inlined_call_operand.vmem [shape: f32[16,32], index: 1, kind: input, shape index: {}]   ;;  %s954_s2 = inlined_call_operand.vmem [shape: f32[1,32], index: 2, kind: input, shape index: {}]   ;;  %s955_s3 = inlined_call_operand.vmem [shape: f32[32,32], index: 3, kind: input, shape index: {}]   ;;  %s956_s4 = inlined_call_operand.vmem [shape: f32[1,32], index: 4, kind: input, shape index: {}]   ;;  %s957_s5 = inlined_call_operand.vmem [shape: f32[32,128], index: 5, kind: input, shape index: {}]   ;;  %s958_s6 = inlined_call_operand.vmem [shape: f32[1,128], index: 6, kind: input, shape index: {}]   ;;  %s959_s7 = inlined_call_operand.hbm [shape: f32[64,128], index: 7, kind: output, shape index: {}]  }
   0x1   :  { %14 = vsyncpa [#allocation3 + $0x1], 0  ;;  %s799_s24 = smov 0   ;;  %s801_s25 = smov 0  }
   0x2   :  { %s803_s26 = smov 0   ;;  %s805_s27 = smov 0  }
   0x3 LB: > { %s820_s28 = sadd.s32 4294967295, %s755_s27   ;;  %s584_s29 = sadd.s32 4294967294, %s755_s27   ;;  %s755_s27 = sphi %s805_s27, %s965_s27   ;;  %s751_s26 = sphi %s803_s26, %s964_s26   ;;  %s747_s25 = sphi %s801_s25, %s963_s25   ;;  %s743_s24 = sphi %s799_s24, %s962_s24  }
   0x4   : > { %s824_s30 = sadd.s32 1, %s755_s27   ;;  %s179_s8 = sadd.s32 1, %s751_s26 }
   0x5   : > { %s176_s9 = ssub.s32 %s755_s27, %s824_s30  ;;  %p189_p0 = scmp.ne.s32.totalorder %s751_s26, %s747_s25 }
   0x6   : > { %p177_p1 = scmp.eq.s32.totalorder %s176_s9, 0  ;;  %p190_p2 = scmp.eq.s32.totalorder %s820_s28, 1 }
   0x7   : > { %p195_p3 = scmp.ne.s32.totalorder %s747_s25, %s743_s24  ;;  %p196_p4 = scmp.eq.s32.totalorder %s584_s29, 1 }
   0x8   : > { %s835_s10 = scalar_select %p177_p1, %s751_s26, %s179_s8  }
   0x9   : > { %p837_p5 = por %p190_p2, %p189_p0  ;;  %p841_p6 = por %p196_p4, %p195_p3 }
   0xa   : > { %p587_p7 = scmp.ge.s32.totalorder %s755_s27, 1  ;;  %p241_p8 = scmp.lt.s32.totalorder %s755_s27, 3 }
   0xc   : > { %p242_p9 = pnand %p587_p7, %p241_p8 }
   0xd   : > { %s589_s17 = sshll.u32 (!%p242_p9), %s820_s28, 2  ;;  %s270_s16 = sand.u32 (!%p242_p9), 1, %s747_s25  }
   0xe   : > { %245 = sbr.rel (%p242_p9) target bundleno = 486 (0x1e6), region = 48  ;;  %p274_p10 = scmp.lt.s32.totalorder (!%p242_p9), %s589_s17, 7 }
   0xf   : > { %s608_s19 = sshll.u32 (!%p242_p9), %s820_s28, 5  ;;  %s507_s28 = scalar_lea.sflag (!%p242_p9), [#allocation3], %s270_s16 }
  0x10   : > { %s518_s22 = scalar_lea.hbm (!%p242_p9), %s959_s7, %s608_s19  ;;  %s713_s15 = scalar_lea.hbm (!%p242_p9), %s959_s7, 64 }
  0x11   : > { %s521_s29 = sshll.u32 (!%p242_p9), %s518_s22, 4  ;;  %s522_s29 = int_to_ptr.hbm [resolvable:$true] %s521_s29 }
  0x12   : > { %s707_s8 = sshra.s32 (!%p242_p9), %s522_s29, 4  ;;  %s708_s8 = int_to_ptr.hbm [resolvable:$true] %s707_s8 }
  0x13   : > { %v285_v0 = vld [vmem:[%s953_s1 + $0x8] sm:$0xff]  ;;  %v284_v1 = vld [vmem:[%s953_s1] sm:$0xff]  ;;  %s967_s17 = smov (!%p274_p10, %s589_s17), 7  ;;  %vm290_vm0 = vcmask 130048   ;;  %v339_v6 = vld [vmem:[%s955_s3 + $0x18] sm:$0xff]  ;;  %vm344_vm1 = vcmask 261120   ;;  %v439_v48 = vlaneseq  ;;  %p714_p0 = scmp.lt.s32.totalorder %s708_s8, %s959_s7 }
  0x14   : > { %317 = vmatpush.msra.mxu0 %v285_v0  ;;  %s590_s18 = sshll.u32 %s967_s17, 3  ;;  %369 = vmatpush.msra.mxu1 %v339_v6  ;;  %v338_v7 = vld [vmem:[%s955_s3 + $0x10] sm:$0xff]  ;;  %v337_v8 = vld [vmem:[%s955_s3 + $0x8] sm:$0xff]  ;;  %v336_v9 = vld [vmem:[%s955_s3] sm:$0xff]  ;;  %s588_s17 = sshll.u32 %s270_s16, 5 }
  0x15   : > { %s277_s21 = scalar_lea.vmem %s952_s0, %s590_s18  ;;  %609 = vmatpush.msra.mxu3 %v339_v6  ;;  %v658_v10 = vld [vmem:[%s954_s2] ss:$0 sm:$0xff]  ;;  %v393_v23 = vld [vmem:[%s957_s5 + $0x18] sm:$0xff]  ;;  %v392_v24 = vld [vmem:[%s957_s5 + $0x10] sm:$0xff]  ;;  %v899_v50 = vand.u32 127, %v439_v48  ;;  %s906_s18 = scalar_lea.vmem [#allocation2], %s588_s17 }
  0x16   : > { %318 = vmatpush.msra.mxu0 %v284_v1  ;;  %v280_v2 = vld [vmem:[%s277_s21] sm:$0xff]  ;;  %v281_v3 = vld [vmem:[%s277_s21 + $0x8] sm:$0xff]  ;;  %v282_v4 = vld [vmem:[%s277_s21 + $0x10] sm:$0xff]  ;;  %370 = vmatpush.msra.mxu1 %v338_v7  ;;  %s519_s23 = sshll.u32 %s906_s18, 4  ;;  %s709_s9 = scalar_lea.hbm %s708_s8, 32  ;;  %s520_s23 = int_to_ptr.vmem [resolvable:$true] %s519_s23 }
  0x17   : > { %591 = vmatmul.msk.f32.vlgmr.msra.gmra.mxu0 %vm290_vm0, %v280_v2  ;;  %v283_v5 = vld [vmem:[%s277_s21 + $0x18] sm:$0xff]  ;;  %610 = vmatpush.msra.mxu3 %v338_v7  ;;  %v391_v25 = vld [vmem:[%s957_s5 + $0x8] sm:$0xff]  ;;  %v390_v26 = vld [vmem:[%s957_s5] sm:$0xff]  ;;  %vm441_vm2 = vcmp.ge.s32.totalorder %v899_v50, 8  ;;  %p710_p11 = scmp.ne.s32.totalorder %s708_s8, %s709_s9  ;;  %p715_p1 = scmp.lt.s32.totalorder %s713_s15, %s709_s9 }
  0x18   : > { %371 = vmatpush.msra.mxu1 %v337_v8  ;;  %613 = vmatpush.msra.mxu2 %v393_v23  ;;  %v659_v27 = vld [vmem:[%s956_s4] ss:$0 sm:$0xff] }
  0x19   : > { %611 = vmatpush.msra.mxu3 %v337_v8  ;;  %v660_v40 = vld [vmem:[%s958_s6] ss:$0 sm:$0xff]  ;;  %p711_p12 = pnand %p710_p11, %p837_p5  ;;  %p716_p2 = por %p715_p1, %p714_p0 }
  0x1a   : > { %372 = vmatpush.msra.mxu1 %v336_v9  ;;  %614 = vmatpush.msra.mxu2 %v392_v24 }
  0x1b   : > { %612 = vmatpush.msra.mxu3 %v336_v9  ;;  %p712_p13 = pneg %p711_p12 }
  0x1c   : > { %422 = vmatpush.msrb.mxu1 %v393_v23  ;;  %615 = vmatpush.msra.mxu2 %v391_v25 }
  0x1d   : > { %p717_p3 = pnand %p716_p2, %p712_p13 }
  0x1e   : > { %423 = vmatpush.msrb.mxu1 %v392_v24  ;;  %616 = vmatpush.msra.mxu2 %v390_v26 }
  0x1f   : > { %592 = vmatmul.msk.f32.gmra.mxu0 %vm290_vm0, %v281_v3 }
  0x20   : > { %424 = vmatpush.msrb.mxu1 %v391_v25 }
  0x22   : > { %425 = vmatpush.msrb.mxu1 %v390_v26 }
  0x27   : > { %593 = vmatmul.msk.f32.gmra.mxu0 %vm290_vm0, %v282_v4 }
  0x2f   : > { %594 = vmatmul.msk.f32.gmra.mxu0 %vm290_vm0, %v283_v5 }
  0x94   : > { %v320_v11 = vpop.f32.mrf.mxu0 }
  0x95   : > { %v321_v12 = vadd.f32 %v658_v10, %v320_v11 }
  0x97   : > { %661 = vtanh.f32 %v321_v12 }
  0x9c   : > { %v323_v13 = vpop.f32.mrf.mxu0 }
  0x9d   : > { %v662_v14 = vpop.eup %661  ;;  %v324_v15 = vadd.f32 %v658_v10, %v323_v13 }
  0x9e   : > { %595 = vmatmul.msk.f32.vlgmr.msra.gmra.mxu1 %vm344_vm1, %v662_v14 }
  0x9f   : > { %663 = vtanh.f32 %v324_v15 }
  0xa4   : > { %v326_v16 = vpop.f32.mrf.mxu0 }
  0xa5   : > { %v664_v17 = vpop.eup %663  ;;  %v327_v18 = vadd.f32 %v658_v10, %v326_v16 }
  0xa6   : > { %596 = vmatmul.msk.f32.vlgmr.msra.gmra.mxu3 %vm344_vm1, %v664_v17 }
  0xa7   : > { %665 = vtanh.f32 %v327_v18 }
  0xac   : > { %v329_v19 = vpop.f32.mrf.mxu0 }
  0xad   : > { %v666_v20 = vpop.eup %665  ;;  %v330_v21 = vadd.f32 %v658_v10, %v329_v19 }
  0xae   : > { %597 = vmatmul.msk.f32.gmra.mxu3 %vm344_vm1, %v666_v20 }
  0xaf   : > { %667 = vtanh.f32 %v330_v21 }
  0xb5   : > { %v668_v22 = vpop.eup %667 }
  0xb6   : > { %598 = vmatmul.msk.f32.gmra.mxu3 %vm344_vm1, %v668_v22 }
 0x11b   : > { %v374_v28 = vpop.f32.mrf.mxu1 }
 0x11c   : > { %v375_v29 = vadd.f32 %v659_v27, %v374_v28 }
 0x11e   : > { %669 = vtanh.f32 %v375_v29 }
 0x124   : > { %v670_v30 = vpop.eup %669 }
 0x125   : > { %599 = vmatmul.msk.f32.vlgmr.msrb.gmra.mxu1 %vm344_vm1, %v670_v30 }
 0x129   : > { %v377_v31 = vpop.f32.mrf.mxu3 }
 0x12a   : > { %v378_v32 = vadd.f32 %v659_v27, %v377_v31 }
 0x12c   : > { %671 = vtanh.f32 %v378_v32 }
 0x131   : > { %v380_v33 = vpop.f32.mrf.mxu3 }
 0x132   : > { %v672_v34 = vpop.eup %671  ;;  %v381_v35 = vadd.f32 %v659_v27, %v380_v33 }
 0x133   : > { %600 = vmatmul.msk.f32.vlgmr.msra.gmra.mxu2 %vm344_vm1, %v672_v34 }
 0x134   : > { %673 = vtanh.f32 %v381_v35 }
 0x139   : > { %v383_v36 = vpop.f32.mrf.mxu3 }
 0x13a   : > { %v674_v37 = vpop.eup %673  ;;  %v384_v38 = vadd.f32 %v659_v27, %v383_v36 }
 0x13b   : > { %601 = vmatmul.msk.f32.gmra.mxu2 %vm344_vm1, %v674_v37 }
 0x13c   : > { %675 = vtanh.f32 %v384_v38 }
 0x142   : > { %v676_v39 = vpop.eup %675 }
 0x143   : > { %602 = vmatmul.msk.f32.gmra.mxu2 %vm344_vm1, %v676_v39 }
 0x1a2   : > { %v427_v41 = vpop.f32.mrf.mxu1 }
 0x1a3   : > { %v428_v42 = vadd.f32 %v660_v40, %v427_v41 }
 0x1a5   : > { %v446_v43 = vmin.f32 %v428_v42, 20.0  ;;  %vm442_vm4 = vcmp.gt.f32.partialorder %v428_v42, 20.0 }
 0x1a7   : > { %v450_v44 = vmul.f32 1.442695, %v446_v43 }
 0x1a9   : > { %677 = vpow2.f32 %v450_v44 }
 0x1af   : > { %v678_v45 = vpop.eup %677 }
 0x1b0   : > { %v458_v46 = vadd.f32 1.0, %v678_v45  ;;  %v461_v47 = vmul.f32 -0.5, %v678_v45  ;;  %v464_v51 = vand.u32 2147483647, %v678_v45 }
 0x1b2   : > { %679 = vlog2.f32 %v458_v46  ;;  %v462_v49 = vadd.f32 1.0, %v461_v47  ;;  %vm465_vm3 = vcmp.lt.f32.partialorder %v464_v51, 0.0004427343 }
 0x1b4   : > { %v463_v56 = vmul.f32 %v678_v45, %v462_v49 }
 0x1b6   : > { %v430_v52 = vpop.f32.mrf.mxu2 }
 0x1b7   : > { %v431_v53 = vadd.f32 %v660_v40, %v430_v52 }
 0x1b8   : > { %v680_v54 = vpop.eup %679 }
 0x1b9   : > { %v460_v55 = vmul.f32 0.6931472, %v680_v54  ;;  %v447_v57 = vmin.f32 %v431_v53, 20.0  ;;  %vm443_vm6 = vcmp.gt.f32.partialorder %v431_v53, 20.0 }
 0x1bb   : > { %v466_v58 = vsel %vm465_vm3, %v463_v56, %v460_v55  ;;  %v452_v59 = vmul.f32 1.442695, %v447_v57 }
 0x1bc   : > { %v494_v60 = vsel %vm442_vm4, %v428_v42, %v466_v58 }
 0x1bd   : > { %v498_v61 = vsel %vm441_vm2, %v494_v60, %v428_v42  ;;  %681 = vpow2.f32 %v452_v59 }
 0x1be   : > { %502 = vst [vmem:[%s906_s18] sm:$0xff] %v498_v61  ;;  %v433_v62 = vpop.f32.mrf.mxu2 }
 0x1bf   : > { %v434_v63 = vadd.f32 %v660_v40, %v433_v62 }
 0x1c1   : > { %v448_v0 = vmin.f32 %v434_v63, 20.0  ;;  %vm444_vm8 = vcmp.gt.f32.partialorder %v434_v63, 20.0 }
 0x1c3   : > { %v682_v1 = vpop.eup %681  ;;  %v454_v2 = vmul.f32 1.442695, %v448_v0 }
 0x1c4   : > { %v467_v3 = vadd.f32 1.0, %v682_v1  ;;  %v470_v4 = vmul.f32 -0.5, %v682_v1  ;;  %v473_v9 = vand.u32 2147483647, %v682_v1 }
 0x1c5   : > { %683 = vpow2.f32 %v454_v2 }
 0x1c6   : > { %685 = vlog2.f32 %v467_v3  ;;  %v436_v5 = vpop.f32.mrf.mxu2  ;;  %v471_v7 = vadd.f32 1.0, %v470_v4  ;;  %vm474_vm5 = vcmp.lt.f32.partialorder %v473_v9, 0.0004427343 }
 0x1c7   : > { %v437_v6 = vadd.f32 %v660_v40, %v436_v5 }
 0x1c8   : > { %v472_v15 = vmul.f32 %v682_v1, %v471_v7 }
 0x1c9   : > { %v449_v8 = vmin.f32 %v437_v6, 20.0  ;;  %vm445_vm10 = vcmp.gt.f32.partialorder %v437_v6, 20.0 }
 0x1cb   : > { %v684_v10 = vpop.eup %683  ;;  %v456_v11 = vmul.f32 1.442695, %v449_v8 }
 0x1cc   : > { %v686_v12 = vpop.eup %685  ;;  %v476_v13 = vadd.f32 1.0, %v684_v10  ;;  %v479_v16 = vmul.f32 -0.5, %v684_v10  ;;  %v482_v21 = vand.u32 2147483647, %v684_v10 }
 0x1cd   : > { %v469_v14 = vmul.f32 0.6931472, %v686_v12  ;;  %687 = vpow2.f32 %v456_v11 }
 0x1ce   : > { %689 = vlog2.f32 %v476_v13  ;;  %v480_v20 = vadd.f32 1.0, %v479_v16  ;;  %vm483_vm7 = vcmp.lt.f32.partialorder %v482_v21, 0.0004427343 }
 0x1cf   : > { %v475_v17 = vsel %vm474_vm5, %v472_v15, %v469_v14 }
 0x1d0   : > { %v495_v18 = vsel %vm443_vm6, %v431_v53, %v475_v17  ;;  %v481_v26 = vmul.f32 %v684_v10, %v480_v20 }
 0x1d1   : > { %v499_v19 = vsel %vm441_vm2, %v495_v18, %v431_v53 }
 0x1d2   : > { %503 = vst [vmem:[%s906_s18 + $0x8] sm:$0xff] %v499_v19 }
 0x1d3   : > { %v688_v22 = vpop.eup %687 }
 0x1d4   : > { %v690_v23 = vpop.eup %689  ;;  %v485_v24 = vadd.f32 1.0, %v688_v22  ;;  %v488_v27 = vmul.f32 -0.5, %v688_v22  ;;  %v491_v32 = vand.u32 2147483647, %v688_v22 }
 0x1d5   : > { %v478_v25 = vmul.f32 0.6931472, %v690_v23 }
 0x1d6   : > { %691 = vlog2.f32 %v485_v24  ;;  %v489_v31 = vadd.f32 1.0, %v488_v27  ;;  %vm492_vm9 = vcmp.lt.f32.partialorder %v491_v32, 0.0004427343 }
 0x1d7   : > { %v484_v28 = vsel %vm483_vm7, %v481_v26, %v478_v25 }
 0x1d8   : > { %v496_v29 = vsel %vm444_vm8, %v434_v63, %v484_v28  ;;  %v490_v35 = vmul.f32 %v688_v22, %v489_v31 }
 0x1d9   : > { %v500_v30 = vsel %vm441_vm2, %v496_v29, %v434_v63 }
 0x1da   : > { %504 = vst [vmem:[%s906_s18 + $0x10] sm:$0xff] %v500_v30 }
 0x1dc   : > { %v692_v33 = vpop.eup %691 }
 0x1dd   : > { %v487_v34 = vmul.f32 0.6931472, %v692_v33 }
 0x1df   : > { %v493_v36 = vsel %vm492_vm9, %v490_v35, %v487_v34 }
 0x1e0   : > { %v497_v37 = vsel %vm445_vm10, %v437_v6, %v493_v36 }
 0x1e1   : > { %v501_v38 = vsel %vm441_vm2, %v497_v37, %v437_v6 }
 0x1e2   : > { %505 = vst [vmem:[%s906_s18 + $0x18] sm:$0xff] %v501_v38 }
 0x1e3   : > { %720 = shalt.err (!%p717_p3)
}
 0x1e4   : > { %s757_s16 = smov 128   ;;  %s758_s18 = smov 8  }
 0x1e5   : > { %617 = dma.vmem_to_hbm [thread:$0]  (%p837_p5), %s520_s23, 512, %s522_s29, %s507_s28, %s757_s16, %s757_s16, %s758_s18  }
 0x1e6 PF: > { %p623_p4 = scmp.ge.s32.totalorder %s755_s27, 2  ;;  %s536_s20 = sand.u32 1, %s743_s24  }
 0x1e7   : > { %s537_s21 = scalar_lea.sflag [#allocation3], %s536_s20 }
 0x1e8   : > { %p620_p7 = pnand %p623_p4, %p841_p6 }
 0x1ea   : > { %p621_p8 = pneg %p620_p7 }
 0x1ec   : > { %738 = dma.done.wait (%p621_p8), %s537_s21, 512  }
 0x1ed   : > { %740 = vsyncadd (%p621_p8), %s537_s21, 4294966784  ;;  %p17_p9 = scmp.ge.s32.totalorder %s824_s30, 4   ;;  %s962_s24 = smov %s747_s25 }
 0x1ee   : > { %s963_s25 = smov %s751_s26  ;;  %s964_s26 = smov %s835_s10 }
 0x1ef   : > { %s965_s27 = smov %s824_s30  ;;  %19 = sbr.rel (!%p17_p9) target bundleno = 3 (0x3), region = 83 }
 0x1f4   :  { %543 = vsyncpa [#allocation3], 1 }
 0x1f5   :  { %545 = vsyncpa [#allocation3 + $0x1], 1 }

</bundles_post_ra>
